<compile_context>
chip_gen: v6e
topology: v6e:2x2x1
jax: 0.10.0
libtpu: 0.0.40
codegen_flags: <defaults>
</compile_context>

<pallas_src>
import functools

import jax
import jax.numpy as jnp
from jax.experimental import pallas as pl
from jax.experimental.pallas import tpu as pltpu


def _round_up(x, m):
    return ((x + m - 1) // m) * m


# ----------------------------------------------------------------------------
# Fused NT-Xent kernel: one grid step handles a tile of `tm` rows of sim.
# Inputs:  zt_ref     [tm, D]        row tile of z (matmul dtype)
#          inv_nt_ref [tm, 1]        1 / max(||z_row||, sqrt(eps))          (f32)
#          z_ref      [n_col, D]     all of z, column-padded (matmul dtype)
#          inv_nz_ref [1, n_col]     (1/T) / max(||z_col||, sqrt(eps))      (f32)
# Output:  loss_ref   [tm, 1]        per-row CE loss (0 for padded rows)
# ----------------------------------------------------------------------------
def _nt_xent_kernel(zt_ref, inv_nt_ref, z_ref, inv_nz_ref, loss_ref, *,
                    batch, n_valid):
    i = pl.program_id(0)
    tm = zt_ref.shape[0]
    n_col = z_ref.shape[0]

    # ---- similarity tile: [tm, n_col].  Divide replaced by two broadcast muls.
    dots = jax.lax.dot_general(
        zt_ref[...], z_ref[...], (((1,), (1,)), ((), ())),
        preferred_element_type=jnp.float32)                    # [tm, n_col]
    sim = dots * inv_nt_ref[...] * inv_nz_ref[...]             # (tm,1)*(1,n_col)

    # ---- masks from one full-tile iota + (tm, 1) column vectors.
    row0 = i * tm
    col_ids = jax.lax.broadcasted_iota(jnp.int32, (tm, n_col), 1)
    row_idx = jax.lax.broadcasted_iota(jnp.int32, (tm, 1), 0) + row0
    partner = jnp.where(row_idx < batch, row_idx + batch, row_idx - batch)

    # pos[i] = sim[i, i+B] + sim[i+B, i] = 2 * sim[i, partner]  (sim symmetric)
    pos = 2.0 * jnp.sum(jnp.where(col_ids == partner, sim, 0.0),
                        axis=-1, keepdims=True)                # [tm, 1]

    invalid = (col_ids == row_idx) | (col_ids >= n_valid)      # diag + col padding
    neg = jnp.where(invalid, -1e30, sim)

    # ---- cross-entropy with label 0 == logsumexp(logits) - pos (stable).
    m = jnp.maximum(jnp.max(neg, axis=-1, keepdims=True), pos)  # [tm, 1]
    sumexp = (jnp.sum(jnp.exp(neg - m), axis=-1, keepdims=True)
              + jnp.exp(pos - m))
    row_loss = m + jnp.log(sumexp) - pos                        # [tm, 1]

    row_valid = row_idx < n_valid                                # row padding mask
    loss_ref[...] = jnp.where(row_valid, row_loss, 0.0)


def contrastive_loss(z1, z2, temperature, *, tm=128, use_bf16=False):
    """Pallas TPU implementation of the ContrastiveLoss forward pass."""
    assert z1.shape == z2.shape
    B, D = z1.shape
    N = 2 * B
    z = jnp.concatenate([z1, z2], axis=0).astype(jnp.float32)   # [N, D]

    # Reciprocal norms precomputed once (f32).  Per-factor clamp at sqrt(1e-8)
    # is numerically equivalent to the reference's max(||zi||*||zj||, 1e-8)
    # for real embeddings; 1/T is folded into the column copy.
    norms = jnp.sqrt(jnp.sum(z * z, axis=1, keepdims=True))     # [N, 1]
    inv_n = 1.0 / jnp.maximum(norms, 1e-4)                      # [N, 1]

    # Row tiling (multiple of 8, clamped for tiny N); rows padded to tm.
    tm = _round_up(max(8, min(tm, _round_up(N, 8))), 8)
    n_row_pad = _round_up(N, tm)
    n_tiles = n_row_pad // tm
    # Column padding decoupled from tm: lane-dense multiple of 128.
    n_col_pad = _round_up(N, 128)

    mm_dtype = jnp.bfloat16 if use_bf16 else jnp.float32
    z_rows = jnp.pad(z, ((0, n_row_pad - N), (0, 0))).astype(mm_dtype)
    z_cols = jnp.pad(z, ((0, n_col_pad - N), (0, 0))).astype(mm_dtype)
    inv_rows = jnp.pad(inv_n, ((0, n_row_pad - N), (0, 0)))                 # [n_row_pad, 1]
    inv_cols = jnp.pad((inv_n * (1.0 / float(temperature))).T,
                       ((0, 0), (0, n_col_pad - N)))                        # [1, n_col_pad]

    # VMEM budget (double-buffered blocks + live [tm, n_col] temporaries).
    bz = jnp.dtype(mm_dtype).itemsize
    est = (2 * tm * D * bz                 # pipelined row tile
           + 2 * n_col_pad * D * bz        # resident z (columns)
           + 2 * tm * 128 * 4              # row inv-norms (sublane-tiled)
           + 2 * 8 * n_col_pad * 4         # col inv-norms
           + 2 * tm * 128 * 4              # output block
           + 8 * tm * n_col_pad * 4)       # live [tm, n_col] f32 temporaries
    vmem_limit = int(min(max(2 * est, 8 << 20), 64 << 20))

    kernel = functools.partial(_nt_xent_kernel, batch=B, n_valid=N)

    per_row = pl.pallas_call(
        kernel,
        out_shape=jax.ShapeDtypeStruct((n_row_pad, 1), jnp.float32),
        grid=(n_tiles,),
        in_specs=[
            pl.BlockSpec((tm, D), lambda i: (i, 0)),             # row tile of z
            pl.BlockSpec((tm, 1), lambda i: (i, 0)),             # row 1/norm
            pl.BlockSpec((n_col_pad, D), lambda i: (0, 0)),      # full z (VMEM resident)
            pl.BlockSpec((1, n_col_pad), lambda i: (0, 0)),      # col 1/(norm*T)
        ],
        out_specs=pl.BlockSpec((tm, 1), lambda i: (i, 0)),
        compiler_params=pltpu.CompilerParams(
            dimension_semantics=("parallel",),                   # megacore-shardable
            vmem_limit_bytes=vmem_limit),
    )(z_rows, inv_rows, z_cols, inv_cols)

    # CE mean over N rows, then / (2B) == sum(row_loss) / N^2.
    return jnp.sum(per_row) * (1.0 / (float(N) * float(N)))


# ----------------------------------------------------------------------------
# Pure-JAX reference (faithful transcription of the PyTorch module).
# ----------------------------------------------------------------------------
def reference_loss(z1, z2, temperature):
    z = jnp.concatenate([z1, z2], axis=0)
    B = z1.shape[0]
    N = 2 * B
    norm = jnp.sqrt(jnp.sum(z * z, axis=1))
    sim = (z @ z.T) / jnp.maximum(norm[:, None] * norm[None, :], 1e-8)
    sim = sim / temperature
    pos_half = jnp.diagonal(sim, B) + jnp.diagonal(sim, -B)           # [B]
    pos = jnp.concatenate([pos_half, pos_half], axis=0)               # [N]
    idx = jnp.arange(N)
    cols = jnp.arange(N - 1)
    col_idx = cols[None, :] + (cols[None, :] >= idx[:, None]).astype(jnp.int32)
    neg = jnp.take_along_axis(sim, col_idx, axis=1)                   # [N, N-1]
    logits = jnp.concatenate([pos[:, None], neg], axis=1)             # [N, N]
    lse = jax.nn.logsumexp(logits, axis=1)
    ce = jnp.mean(lse - logits[:, 0])                                 # label = 0
    return ce / N


if __name__ == "__main__":
    key = jax.random.PRNGKey(0)
    k1, k2, k3, k4, k5, k6 = jax.random.split(key, 6)

    # Case 1: B=16, D=64 -> N=32 (single tile, column padding to 128).
    B, D, T = 16, 64, 0.5
    z1 = jax.random.normal(k1, (B, D), jnp.float32)
    z2 = jax.random.normal(k2, (B, D), jnp.float32)
    loss = jax.block_until_ready(contrastive_loss(z1, z2, T))
    ref = reference_loss(z1, z2, T)
    assert jnp.isfinite(loss)
    assert jnp.allclose(loss, ref, rtol=1e-4, atol=1e-5), (
        f"mismatch: kernel={float(loss)} ref={float(ref)}")

    # Case 2: B=13, D=48 -> N=26 (exercises row + column masking).
    B2, D2, T2 = 13, 48, 0.2
    z1b = jax.random.normal(k3, (B2, D2), jnp.float32)
    z2b = jax.random.normal(k4, (B2, D2), jnp.float32)
    loss2 = jax.block_until_ready(contrastive_loss(z1b, z2b, T2))
    ref2 = reference_loss(z1b, z2b, T2)
    assert jnp.allclose(loss2, ref2, rtol=1e-4, atol=1e-5), (
        f"mismatch: kernel={float(loss2)} ref={float(ref2)}")

    # Case 3: B=72, D=64 -> N=144 (multiple parallel row tiles, tm=128).
    B3, D3, T3 = 72, 64, 0.7
    z1c = jax.random.normal(k5, (B3, D3), jnp.float32)
    z2c = jax.random.normal(k6, (B3, D3), jnp.float32)
    loss3 = jax.block_until_ready(contrastive_loss(z1c, z2c, T3))
    ref3 = reference_loss(z1c, z2c, T3)
    assert jnp.allclose(loss3, ref3, rtol=1e-4, atol=1e-5), (
        f"mismatch: kernel={float(loss3)} ref={float(ref3)}")

    # bf16 fast path (looser tolerance).
    loss3b = jax.block_until_ready(contrastive_loss(z1c, z2c, T3, use_bf16=True))
    assert jnp.allclose(loss3b, ref3, rtol=2e-2, atol=2e-2), (
        f"bf16 mismatch: kernel={float(loss3b)} ref={float(ref3)}")

    print("KERNEL_OK")
</pallas_src>

<mosaic_0001>
module attributes {stable_mosaic.version = 11 : i64} {
  func.func @_nt_xent_kernel(%arg0: i32, %arg1: memref<32x64xf32, #tpu.memory_space<vmem>>, %arg2: memref<32x1xf32, #tpu.memory_space<vmem>>, %arg3: memref<128x64xf32, #tpu.memory_space<vmem>>, %arg4: memref<1x128xf32, #tpu.memory_space<vmem>>, %arg5: memref<32x1xf32, #tpu.memory_space<vmem>>) attributes {dimension_semantics = [#tpu.dimension_semantics<parallel>], iteration_bounds = array<i64: 1>, scalar_prefetch = 0 : i64, scratch_operands = 0 : i64, tpu.core_type = #tpu.core_type<tc>, window_params = [{transform_indices = @transform_0, window_bounds = array<i64: 32, 64>}, {transform_indices = @transform_1, window_bounds = array<i64: 32, 1>}, {pipeline_mode = #tpu.pipeline_mode<synchronous>, transform_indices = @transform_2, window_bounds = array<i64: 128, 64>}, {pipeline_mode = #tpu.pipeline_mode<synchronous>, transform_indices = @transform_3, window_bounds = array<i64: 1, 128>}, {transform_indices = @transform_4, window_bounds = array<i64: 32, 1>}]} {
    %c0 = arith.constant 0 : index
    %c0_0 = arith.constant 0 : index
    %0 = vector.load %arg1[%c0, %c0_0] : memref<32x64xf32, #tpu.memory_space<vmem>>, vector<32x64xf32>
    %c0_1 = arith.constant 0 : index
    %c0_2 = arith.constant 0 : index
    %1 = vector.load %arg3[%c0_1, %c0_2] : memref<128x64xf32, #tpu.memory_space<vmem>>, vector<128x64xf32>
    %cst = arith.constant dense<0.000000e+00> : vector<32x128xf32>
    %2 = tpu.matmul %0, %1, %cst {dimension_numbers = #tpu.dot_dimension_numbers<[1], [1], [0], [0], [0, 0, 1, 0], [], []>} : vector<32x64xf32>, vector<128x64xf32>, vector<32x128xf32> -> vector<32x128xf32>
    %c0_3 = arith.constant 0 : index
    %c0_4 = arith.constant 0 : index
    %3 = vector.load %arg2[%c0_3, %c0_4] : memref<32x1xf32, #tpu.memory_space<vmem>>, vector<32x1xf32>
    %4 = vector.broadcast %3 : vector<32x1xf32> to vector<32x128xf32>
    %5 = arith.mulf %2, %4 : vector<32x128xf32>
    %c0_5 = arith.constant 0 : index
    %c0_6 = arith.constant 0 : index
    %6 = vector.load %arg4[%c0_5, %c0_6] : memref<1x128xf32, #tpu.memory_space<vmem>>, vector<1x128xf32>
    %7 = vector.broadcast %6 : vector<1x128xf32> to vector<32x128xf32>
    %8 = arith.mulf %5, %7 : vector<32x128xf32>
    %c32_i32 = arith.constant 32 : i32
    %9 = arith.muli %arg0, %c32_i32 : i32
    %10 = tpu.iota {dimensions = array<i32: 1>} : vector<32x128xi32>
    %11 = tpu.iota {dimensions = array<i32: 0>} : vector<32x1xi32>
    %12 = vector.broadcast %9 : i32 to vector<32x1xi32>
    %13 = arith.addi %11, %12 : vector<32x1xi32>
    %c16_i32 = arith.constant 16 : i32
    %14 = vector.broadcast %c16_i32 : i32 to vector<32x1xi32>
    %15 = arith.cmpi slt, %13, %14 : vector<32x1xi32>
    %c16_i32_7 = arith.constant 16 : i32
    %16 = vector.broadcast %c16_i32_7 : i32 to vector<32x1xi32>
    %17 = arith.addi %13, %16 : vector<32x1xi32>
    %c16_i32_8 = arith.constant 16 : i32
    %18 = vector.broadcast %c16_i32_8 : i32 to vector<32x1xi32>
    %19 = arith.subi %13, %18 : vector<32x1xi32>
    %20 = arith.select %15, %17, %19 : vector<32x1xi1>, vector<32x1xi32>
    %21 = vector.broadcast %20 : vector<32x1xi32> to vector<32x128xi32>
    %22 = arith.cmpi eq, %10, %21 : vector<32x128xi32>
    %cst_9 = arith.constant 0.000000e+00 : f32
    %23 = vector.broadcast %cst_9 : f32 to vector<32x128xf32>
    %24 = arith.select %22, %8, %23 : vector<32x128xi1>, vector<32x128xf32>
    %cst_10 = arith.constant dense<0.000000e+00> : vector<32xf32>
    %25 = vector.multi_reduction <add>, %24, %cst_10 [1] : vector<32x128xf32> to vector<32xf32>
    %26 = vector.shape_cast %25 : vector<32xf32> to vector<32x1xf32>
    %cst_11 = arith.constant 2.000000e+00 : f32
    %27 = vector.broadcast %cst_11 : f32 to vector<32x1xf32>
    %28 = arith.mulf %27, %26 : vector<32x1xf32>
    %29 = vector.broadcast %13 : vector<32x1xi32> to vector<32x128xi32>
    %30 = arith.cmpi eq, %10, %29 : vector<32x128xi32>
    %c32_i32_12 = arith.constant 32 : i32
    %31 = vector.broadcast %c32_i32_12 : i32 to vector<32x128xi32>
    %32 = arith.cmpi sge, %10, %31 : vector<32x128xi32>
    %33 = arith.ori %30, %32 : vector<32x128xi1>
    %cst_13 = arith.constant -1.000000e+30 : f32
    %34 = vector.broadcast %cst_13 : f32 to vector<32x128xf32>
    %35 = arith.select %33, %34, %8 : vector<32x128xi1>, vector<32x128xf32>
    %cst_14 = arith.constant dense<0xFF800000> : vector<32xf32>
    %36 = vector.multi_reduction <maximumf>, %35, %cst_14 [1] : vector<32x128xf32> to vector<32xf32>
    %37 = vector.shape_cast %36 : vector<32xf32> to vector<32x1xf32>
    %38 = arith.maximumf %37, %28 : vector<32x1xf32>
    %39 = vector.broadcast %38 : vector<32x1xf32> to vector<32x128xf32>
    %40 = arith.subf %35, %39 : vector<32x128xf32>
    %41 = math.exp %40 : vector<32x128xf32>
    %cst_15 = arith.constant dense<0.000000e+00> : vector<32xf32>
    %42 = vector.multi_reduction <add>, %41, %cst_15 [1] : vector<32x128xf32> to vector<32xf32>
    %43 = vector.shape_cast %42 : vector<32xf32> to vector<32x1xf32>
    %44 = arith.subf %28, %38 : vector<32x1xf32>
    %45 = math.exp %44 : vector<32x1xf32>
    %46 = arith.addf %43, %45 : vector<32x1xf32>
    %47 = math.log %46 : vector<32x1xf32>
    %48 = arith.addf %38, %47 : vector<32x1xf32>
    %49 = arith.subf %48, %28 : vector<32x1xf32>
    %c32_i32_16 = arith.constant 32 : i32
    %50 = vector.broadcast %c32_i32_16 : i32 to vector<32x1xi32>
    %51 = arith.cmpi slt, %13, %50 : vector<32x1xi32>
    %cst_17 = arith.constant 0.000000e+00 : f32
    %52 = vector.broadcast %cst_17 : f32 to vector<32x1xf32>
    %53 = arith.select %51, %49, %52 : vector<32x1xi1>, vector<32x1xf32>
    %c0_18 = arith.constant 0 : index
    %c0_19 = arith.constant 0 : index
    %54 = vector.load %arg5[%c0_18, %c0_19] : memref<32x1xf32, #tpu.memory_space<vmem>>, vector<32x1xf32>
    tpu.vector_store %arg5[%c0_18, %c0_19], %53 {strides = array<i32>} : memref<32x1xf32, #tpu.memory_space<vmem>>, vector<32x1xf32>,
    return
  }
  func.func @transform_0(%arg0: i32) -> (i32, i32) {
    %c0_i32 = arith.constant 0 : i32
    %c0_i32_0 = arith.constant 0 : i32
    return %arg0, %c0_i32 : i32, i32
  }
  func.func @transform_1(%arg0: i32) -> (i32, i32) {
    %c0_i32 = arith.constant 0 : i32
    %c0_i32_0 = arith.constant 0 : i32
    return %arg0, %c0_i32 : i32, i32
  }
  func.func @transform_2(%arg0: i32) -> (i32, i32) {
    %c0_i32 = arith.constant 0 : i32
    %c0_i32_0 = arith.constant 0 : i32
    %c0_i32_1 = arith.constant 0 : i32
    return %c0_i32, %c0_i32_0 : i32, i32
  }
  func.func @transform_3(%arg0: i32) -> (i32, i32) {
    %c0_i32 = arith.constant 0 : i32
    %c0_i32_0 = arith.constant 0 : i32
    %c0_i32_1 = arith.constant 0 : i32
    return %c0_i32, %c0_i32_0 : i32, i32
  }
  func.func @transform_4(%arg0: i32) -> (i32, i32) {
    %c0_i32 = arith.constant 0 : i32
    %c0_i32_0 = arith.constant 0 : i32
    return %arg0, %c0_i32 : i32, i32
  }
}

</mosaic_0001>

<bundles_post_ra>
// kernel: tpu_custom_call.1
= control target key start
LH: loop header
LB: loop body
LE: loop exit
PB: predicated region body
PF: predicated region fallthrough
CT: control target
= control target key end

     0   :  { %vm37_vm0 = vcmask 523264   ;;  %v507_v2 = vmov 0   ;;  %v223_v25 = vlaneseq  ;;  %vm356_vm13 = vcmask 7168   ;;  %s716_s2 = inlined_call_operand.vmem [shape: f32[128,64], index: 2, kind: input, shape index: {}]   ;;  %s717_s0 = inlined_call_operand.vmem [shape: f32[32,64], index: 0, kind: input, shape index: {}]   ;;  %s718_s1 = inlined_call_operand.vmem [shape: f32[32,1], index: 1, kind: input, shape index: {}]   ;;  %s719_s3 = inlined_call_operand.vmem [shape: f32[1,128], index: 3, kind: input, shape index: {}]   ;;  %s720_s4 = inlined_call_operand.vmem [shape: f32[32,1], index: 4, kind: output, shape index: {}]  }
   0x1   :  { %v36_v0 = vld [vmem:[%s716_s2 + $0x78] sm:$0xff]  ;;  %v35_v1 = vld [vmem:[%s716_s2 + $0x70] sm:$0xff]  ;;  %482 = vset.pattern.permute.xlu1 %v507_v2  ;;  %481 = vset.pattern.permute.xlu0 %v507_v2  ;;  %v34_v3 = vld [vmem:[%s716_s2 + $0x68] sm:$0xff] }
   0x2   :  { %410 = vmatprep.subr.msk.mxu0 %vm37_vm0, %v36_v0  ;;  %448 = vmatprep.subr.msk.mxu1 %vm37_vm0, %v36_v0  ;;  %v17_v4 = vld [vmem:[%s717_s0] sm:$0xff]  ;;  %v19_v5 = vld [vmem:[%s717_s0 + $0x10] sm:$0xff]  ;;  %v186_v9 = vld [vmem:[%s718_s1 + $0x18] sm:$0xff]  ;;  %v226_v26 = vshrl.u32 %v223_v25, 7  ;;  %v224_v31 = vand.u32 127, %v223_v25 }
   0x3   :  { %411 = vmatpush3.xpose.msk.msra.mxu0 %vm37_vm0, %v36_v0  ;;  %464 = vmatpush3.xpose.msk.msra.mxu1 %vm37_vm0, %v36_v0  ;;  %v185_v6 = vld [vmem:[%s718_s1 + $0x10] sm:$0xff]  ;;  %v183_v7 = vld [vmem:[%s718_s1] sm:$0xff]  ;;  %v184_v10 = vld [vmem:[%s718_s1 + $0x8] sm:$0xff] }
   0x4   :  { %412 = vmatprep.subr.msk.mxu0 %vm37_vm0, %v35_v1  ;;  %449 = vmatprep.subr.msk.mxu1 %vm37_vm0, %v35_v1  ;;  %v33_v8 = vld [vmem:[%s716_s2 + $0x60] sm:$0xff]  ;;  %v32_v11 = vld [vmem:[%s716_s2 + $0x58] sm:$0xff]  ;;  %v31_v12 = vld [vmem:[%s716_s2 + $0x50] sm:$0xff]  ;;  %v229_v29 = vadd.s32 24, %v226_v26  ;;  %v227_v30 = vadd.s32 8, %v226_v26  ;;  %vm275_vm4 = vcmp.ge.s32.totalorder %v224_v31, 32  ;;  %vm271_vm5 = vcmp.eq.s32.totalorder %v224_v31, %v226_v26 }
   0x5   :  { %442 = vmatprep.mubr.msk.f32.mxu0 %vm37_vm0, %v17_v4  ;;  %445 = vmatprep.mubr.msk.f32.mxu1 %vm37_vm0, %v19_v5  ;;  %v30_v13 = vld [vmem:[%s716_s2 + $0x48] sm:$0xff]  ;;  %v29_v14 = vld [vmem:[%s716_s2 + $0x40] sm:$0xff]  ;;  %v28_v15 = vld [vmem:[%s716_s2 + $0x38] sm:$0xff]  ;;  %v228_v43 = vadd.s32 16, %v226_v26 }
   0x6   :  { %199 = vperm.xlu1 %482, %v185_v6   ;;  %189 = vperm.xlu0 %481, %v183_v7   ;;  %v27_v16 = vld [vmem:[%s716_s2 + $0x30] sm:$0xff]  ;;  %v26_v17 = vld [vmem:[%s716_s2 + $0x28] sm:$0xff]  ;;  %v25_v18 = vld [vmem:[%s716_s2 + $0x20] sm:$0xff]  ;;  %v389_v33 = vadd.s32 4294967280, %v229_v29  ;;  %v240_v34 = vadd.s32 16, %v227_v30  ;;  %vm272_vm1 = vcmp.eq.s32.totalorder %v224_v31, %v227_v30  ;;  %vm274_vm11 = vcmp.eq.s32.totalorder %v224_v31, %v229_v29 }
   0x7   :  { %413 = vmatpush3.xpose.msk.msra.mxu0 %vm37_vm0, %v35_v1  ;;  %465 = vmatpush3.xpose.msk.msra.mxu1 %vm37_vm0, %v35_v1  ;;  %v24_v19 = vld [vmem:[%s716_s2 + $0x18] sm:$0xff]  ;;  %v23_v20 = vld [vmem:[%s716_s2 + $0x10] sm:$0xff]  ;;  %v22_v21 = vld [vmem:[%s716_s2 + $0x8] sm:$0xff]  ;;  %vm251_vm8 = vcmp.eq.s32.totalorder %v224_v31, %v228_v43  ;;  %v388_v54 = vadd.s32 4294967280, %v228_v43 }
   0x8   :  { %414 = vmatprep.subr.msk.mxu0 %vm37_vm0, %v34_v3  ;;  %450 = vmatprep.subr.msk.mxu1 %vm37_vm0, %v34_v3  ;;  %v21_v22 = vld [vmem:[%s716_s2] sm:$0xff]  ;;  %v18_v23 = vld [vmem:[%s717_s0 + $0x8] sm:$0xff]  ;;  %v20_v24 = vld [vmem:[%s717_s0 + $0x18] sm:$0xff]  ;;  %vm254_vm2 = vcmp.eq.s32.totalorder %v224_v31, %v389_v33  ;;  %vm252_vm3 = vcmp.eq.s32.totalorder %v224_v31, %v240_v34 }
   0x9   :  { %v385_v38 = vld [vmem:[%s719_s3] ss:$0 sm:$0xff]  ;;  %vm277_vm6 = vmor %vm272_vm1, %vm275_vm4  ;;  %vm253_vm10 = vcmp.eq.s32.totalorder %v224_v31, %v388_v54 }
   0xa   :  { %204 = vperm.xlu1 %482, %v186_v9   ;;  %194 = vperm.xlu0 %481, %v184_v10   ;;  %vm276_vm7 = vmor %vm271_vm5, %vm275_vm4 }
   0xb   :  { %415 = vmatpush3.xpose.msk.msra.mxu0 %vm37_vm0, %v34_v3  ;;  %466 = vmatpush3.xpose.msk.msra.mxu1 %vm37_vm0, %v34_v3  ;;  %vm278_vm9 = vmor %vm251_vm8, %vm275_vm4 }
   0xc   :  { %416 = vmatprep.subr.msk.mxu0 %vm37_vm0, %v33_v8  ;;  %451 = vmatprep.subr.msk.mxu1 %vm37_vm0, %v33_v8  ;;  %vm279_vm12 = vmor %vm274_vm11, %vm275_vm4 }
   0xf   :  { %417 = vmatpush3.xpose.msk.msra.mxu0 %vm37_vm0, %v33_v8  ;;  %467 = vmatpush3.xpose.msk.msra.mxu1 %vm37_vm0, %v33_v8 }
  0x10   :  { %418 = vmatprep.subr.msk.mxu0 %vm37_vm0, %v32_v11  ;;  %452 = vmatprep.subr.msk.mxu1 %vm37_vm0, %v32_v11 }
  0x13   :  { %419 = vmatpush3.xpose.msk.msra.mxu0 %vm37_vm0, %v32_v11  ;;  %468 = vmatpush3.xpose.msk.msra.mxu1 %vm37_vm0, %v32_v11 }
  0x14   :  { %420 = vmatprep.subr.msk.mxu0 %vm37_vm0, %v31_v12  ;;  %453 = vmatprep.subr.msk.mxu1 %vm37_vm0, %v31_v12 }
  0x17   :  { %421 = vmatpush3.xpose.msk.msra.mxu0 %vm37_vm0, %v31_v12  ;;  %469 = vmatpush3.xpose.msk.msra.mxu1 %vm37_vm0, %v31_v12 }
  0x18   :  { %422 = vmatprep.subr.msk.mxu0 %vm37_vm0, %v30_v13  ;;  %454 = vmatprep.subr.msk.mxu1 %vm37_vm0, %v30_v13 }
  0x1b   :  { %423 = vmatpush3.xpose.msk.msra.mxu0 %vm37_vm0, %v30_v13  ;;  %470 = vmatpush3.xpose.msk.msra.mxu1 %vm37_vm0, %v30_v13 }
  0x1c   :  { %424 = vmatprep.subr.msk.mxu0 %vm37_vm0, %v29_v14  ;;  %455 = vmatprep.subr.msk.mxu1 %vm37_vm0, %v29_v14 }
  0x1f   :  { %425 = vmatpush3.xpose.msk.msra.mxu0 %vm37_vm0, %v29_v14  ;;  %471 = vmatpush3.xpose.msk.msra.mxu1 %vm37_vm0, %v29_v14 }
  0x20   :  { %426 = vmatprep.subr.msk.mxu0 %vm37_vm0, %v28_v15  ;;  %456 = vmatprep.subr.msk.mxu1 %vm37_vm0, %v28_v15 }
  0x23   :  { %427 = vmatpush3.xpose.msk.msra.mxu0 %vm37_vm0, %v28_v15  ;;  %472 = vmatpush3.xpose.msk.msra.mxu1 %vm37_vm0, %v28_v15 }
  0x24   :  { %428 = vmatprep.subr.msk.mxu0 %vm37_vm0, %v27_v16  ;;  %457 = vmatprep.subr.msk.mxu1 %vm37_vm0, %v27_v16 }
  0x27   :  { %429 = vmatpush3.xpose.msk.msra.mxu0 %vm37_vm0, %v27_v16  ;;  %473 = vmatpush3.xpose.msk.msra.mxu1 %vm37_vm0, %v27_v16 }
  0x28   :  { %430 = vmatprep.subr.msk.mxu0 %vm37_vm0, %v26_v17  ;;  %458 = vmatprep.subr.msk.mxu1 %vm37_vm0, %v26_v17 }
  0x2b   :  { %431 = vmatpush3.xpose.msk.msra.mxu0 %vm37_vm0, %v26_v17  ;;  %474 = vmatpush3.xpose.msk.msra.mxu1 %vm37_vm0, %v26_v17 }
  0x2c   :  { %432 = vmatprep.subr.msk.mxu0 %vm37_vm0, %v25_v18  ;;  %459 = vmatprep.subr.msk.mxu1 %vm37_vm0, %v25_v18 }
  0x2f   :  { %433 = vmatpush3.xpose.msk.msra.mxu0 %vm37_vm0, %v25_v18  ;;  %475 = vmatpush3.xpose.msk.msra.mxu1 %vm37_vm0, %v25_v18 }
  0x30   :  { %434 = vmatprep.subr.msk.mxu0 %vm37_vm0, %v24_v19  ;;  %460 = vmatprep.subr.msk.mxu1 %vm37_vm0, %v24_v19 }
  0x33   :  { %435 = vmatpush3.xpose.msk.msra.mxu0 %vm37_vm0, %v24_v19  ;;  %476 = vmatpush3.xpose.msk.msra.mxu1 %vm37_vm0, %v24_v19 }
  0x34   :  { %436 = vmatprep.subr.msk.mxu0 %vm37_vm0, %v23_v20  ;;  %461 = vmatprep.subr.msk.mxu1 %vm37_vm0, %v23_v20 }
  0x37   :  { %437 = vmatpush3.xpose.msk.msra.mxu0 %vm37_vm0, %v23_v20  ;;  %477 = vmatpush3.xpose.msk.msra.mxu1 %vm37_vm0, %v23_v20 }
  0x38   :  { %438 = vmatprep.subr.msk.mxu0 %vm37_vm0, %v22_v21  ;;  %462 = vmatprep.subr.msk.mxu1 %vm37_vm0, %v22_v21 }
  0x3b   :  { %439 = vmatpush3.xpose.msk.msra.mxu0 %vm37_vm0, %v22_v21  ;;  %478 = vmatpush3.xpose.msk.msra.mxu1 %vm37_vm0, %v22_v21 }
  0x3c   :  { %440 = vmatprep.subr.msk.mxu0 %vm37_vm0, %v21_v22  ;;  %463 = vmatprep.subr.msk.mxu1 %vm37_vm0, %v21_v22 }
  0x3f   :  { %441 = vmatpush3.xpose.msk.msra.mxu0 %vm37_vm0, %v21_v22  ;;  %479 = vmatpush3.xpose.msk.msra.mxu1 %vm37_vm0, %v21_v22 }
  0x42   :  { %443 = vmatmul.mubr.msk.f32.vlgmr.msra.gmra.mxu0 %vm37_vm0, %v18_v23  ;;  %446 = vmatmul.mubr.msk.f32.vlgmr.msra.gmra.mxu1 %vm37_vm0, %v20_v24 }
  0x81   :  { %v190_v27 = vpop.permute.xlu0 %189  ;;  %v200_v28 = vpop.permute.xlu1 %199 }
  0x85   :  { %v195_v32 = vpop.permute.xlu0 %194  ;;  %v205_v35 = vpop.permute.xlu1 %204 }
 0x102   :  { %v444_v36 = vpop.f32.mrf.mxu0  ;;  %v447_v37 = vpop.f32.mrf.mxu1 }
 0x103   :  { %v208_v39 = vmul.f32 %v444_v36, %v195_v32  ;;  %v210_v40 = vmul.f32 %v447_v37, %v205_v35 }
 0x104   :  { %v164_v41 = vpop.f32.mrf.mxu0  ;;  %v174_v42 = vpop.f32.mrf.mxu1 }
 0x105   :  { %v207_v44 = vmul.f32 %v190_v27, %v164_v41  ;;  %v221_v45 = vmul.f32 %v385_v38, %v210_v40  ;;  %v219_v46 = vmul.f32 %v385_v38, %v208_v39  ;;  %v209_v47 = vmul.f32 %v200_v28, %v174_v42 }
 0x107   :  { %v258_v48 = vsel %vm254_vm2, %v221_v45, 0.0  ;;  %v256_v49 = vsel %vm252_vm3, %v219_v46, 0.0  ;;  %v218_v50 = vmul.f32 %v385_v38, %v207_v44  ;;  %v281_v51 = vsel %vm277_vm6, -1e+30, %v219_v46 }
 0x108   :  { %265 = vadd.xlane.f32.xlu0 %v258_v48  ;;  %261 = vadd.xlane.f32.xlu1 %v256_v49  ;;  %v220_v53 = vmul.f32 %v385_v38, %v209_v47  ;;  %v283_v58 = vsel %vm279_vm12, -1e+30, %v221_v45 }
 0x109   :  { %v280_v52 = vsel %vm276_vm7, -1e+30, %v218_v50  ;;  %v255_v56 = vsel %vm251_vm8, %v218_v50, 0.0 }
 0x10a   :  { %v282_v55 = vsel %vm278_vm9, -1e+30, %v220_v53  ;;  %v257_v57 = vsel %vm253_vm10, %v220_v53, 0.0 }
 0x10c   :  { %286 = vmax.xlane.f32.xlu0 %v281_v51  ;;  %284 = vmax.xlane.f32.xlu1 %v280_v52 }
 0x110   :  { %288 = vmax.xlane.f32.xlu1 %v282_v55  ;;  %259 = vadd.xlane.f32.xlu0 %v255_v56 }
 0x114   :  { %263 = vadd.xlane.f32.xlu0 %v257_v57 }
 0x118   :  { %290 = vmax.xlane.f32.xlu0 %v283_v58 }
 0x191   :  { %v266_v59 = vpop.xlane.xlu0 %265  ;;  %v262_v60 = vpop.xlane.xlu1 %261 }
 0x192   :  { %v680_v61 = vmul.f32 2.0, %v262_v60  ;;  %v688_v10 = vmul.f32 2.0, %v266_v59 }
 0x195   :  { %v287_v62 = vpop.xlane.xlu0 %286  ;;  %v285_v1 = vpop.xlane.xlu1 %284 }
 0x196   :  { %v293_v63 = vmax.f32 %v287_v62, %v680_v61 }
 0x198   :  { %v297_v0 = vsub.f32 %v281_v51, %v293_v63  ;;  %v317_v23 = vsub.f32 %v680_v61, %v293_v63 }
 0x199   :  { %v260_v2 = vpop.xlane.xlu0 %259  ;;  %v289_v9 = vpop.xlane.xlu1 %288 }
 0x19a   :  { %v302_v3 = vmul.f32 1.442695, %v297_v0  ;;  %v683_v4 = vmul.f32 2.0, %v260_v2  ;;  %v322_v24 = vmul.f32 1.442695, %v317_v23 }
 0x19c   :  { %483 = vpow2.f32 %v302_v3  ;;  %v292_v5 = vmax.f32 %v285_v1, %v683_v4 }
 0x19d   :  { %v264_v6 = vpop.xlane.xlu0 %263 }
 0x19e   :  { %v296_v7 = vsub.f32 %v280_v52, %v292_v5  ;;  %v686_v8 = vmul.f32 2.0, %v264_v6  ;;  %v316_v25 = vsub.f32 %v683_v4, %v292_v5 }
 0x1a0   :  { %v300_v11 = vmul.f32 1.442695, %v296_v7  ;;  %v294_v12 = vmax.f32 %v289_v9, %v686_v8  ;;  %v320_v26 = vmul.f32 1.442695, %v316_v25 }
 0x1a1   :  { %v291_v13 = vpop.xlane.xlu0 %290 }
 0x1a2   :  { %485 = vpow2.f32 %v300_v11  ;;  %v298_v14 = vsub.f32 %v282_v55, %v294_v12  ;;  %v295_v15 = vmax.f32 %v291_v13, %v688_v10  ;;  %v318_v27 = vsub.f32 %v686_v8, %v294_v12 }
 0x1a4   :  { %v304_v16 = vmul.f32 1.442695, %v298_v14  ;;  %v299_v17 = vsub.f32 %v283_v58, %v295_v15  ;;  %v319_v28 = vsub.f32 %v688_v10, %v295_v15  ;;  %v324_v29 = vmul.f32 1.442695, %v318_v27 }
 0x1a6   :  { %487 = vpow2.f32 %v304_v16  ;;  %v306_v18 = vmul.f32 1.442695, %v299_v17  ;;  %v326_v30 = vmul.f32 1.442695, %v319_v28 }
 0x1a8   :  { %489 = vpow2.f32 %v306_v18 }
 0x1a9   :  { %v484_v19 = vpop.eup %483  ;;  %491 = vpow2.f32 %v322_v24 }
 0x1aa   :  { %310 = vadd.xlane.f32.xlu0 %v484_v19  ;;  %493 = vpow2.f32 %v320_v26 }
 0x1ab   :  { %495 = vpow2.f32 %v324_v29 }
 0x1ac   :  { %497 = vpow2.f32 %v326_v30 }
 0x1af   :  { %v486_v20 = vpop.eup %485 }
 0x1b0   :  { %308 = vadd.xlane.f32.xlu1 %v486_v20 }
 0x1b3   :  { %v488_v21 = vpop.eup %487 }
 0x1b4   :  { %312 = vadd.xlane.f32.xlu1 %v488_v21 }
 0x1b5   :  { %v490_v22 = vpop.eup %489 }
 0x1b6   :  { %314 = vadd.xlane.f32.xlu0 %v490_v22  ;;  %v492_v31 = vpop.eup %491 }
 0x1b7   :  { %v494_v34 = vpop.eup %493 }
 0x1b8   :  { %v496_v37 = vpop.eup %495 }
 0x1b9   :  { %v498_v40 = vpop.eup %497 }
 0x233   :  { %v311_v32 = vpop.xlane.xlu0 %310 }
 0x234   :  { %v329_v33 = vadd.f32 %v492_v31, %v311_v32 }
 0x236   :  { %499 = vlog2.f32 %v329_v33 }
 0x239   :  { %v309_v35 = vpop.xlane.xlu1 %308 }
 0x23a   :  { %v328_v36 = vadd.f32 %v494_v34, %v309_v35 }
 0x23c   :  { %501 = vlog2.f32 %v328_v36 }
 0x23d   :  { %v313_v38 = vpop.xlane.xlu1 %312 }
 0x23e   :  { %v330_v39 = vadd.f32 %v496_v37, %v313_v38 }
 0x23f   :  { %v315_v41 = vpop.xlane.xlu0 %314 }
 0x240   :  { %503 = vlog2.f32 %v330_v39  ;;  %v331_v42 = vadd.f32 %v498_v40, %v315_v41 }
 0x242   :  { %505 = vlog2.f32 %v331_v42 }
 0x243   :  { %v500_v43 = vpop.eup %499 }
 0x244   :  { %v335_v44 = vmul.f32 0.6931472, %v500_v43 }
 0x246   :  { %v341_v45 = vadd.f32 %v335_v44, %v293_v63 }
 0x248   :  { %v345_v46 = vsub.f32 %v341_v45, %v680_v61 }
 0x249   :  { %v502_v47 = vpop.eup %501 }
 0x24a   :  { %358 = vst.msk [vmem:[%s720_s4 + $0x8] sm:$0xff] %vm356_vm13, %v345_v46  ;;  %v333_v48 = vmul.f32 0.6931472, %v502_v47 }
 0x24c   :  { %v340_v49 = vadd.f32 %v333_v48, %v292_v5 }
 0x24d   :  { %v504_v50 = vpop.eup %503 }
 0x24e   :  { %v344_v51 = vsub.f32 %v340_v49, %v683_v4  ;;  %v337_v52 = vmul.f32 0.6931472, %v504_v50 }
 0x24f   :  { %v506_v53 = vpop.eup %505 }
 0x250   :  { %357 = vst.msk [vmem:[%s720_s4] sm:$0xff] %vm356_vm13, %v344_v51  ;;  %v342_v54 = vadd.f32 %v337_v52, %v294_v12  ;;  %v339_v55 = vmul.f32 0.6931472, %v506_v53 }
 0x252   :  { %v346_v56 = vsub.f32 %v342_v54, %v686_v8  ;;  %v343_v57 = vadd.f32 %v339_v55, %v295_v15 }
 0x254   :  { %359 = vst.msk [vmem:[%s720_s4 + $0x10] sm:$0xff] %vm356_vm13, %v346_v56  ;;  %v347_v58 = vsub.f32 %v343_v57, %v688_v10 }
 0x256   :  { %360 = vst.msk [vmem:[%s720_s4 + $0x18] sm:$0xff] %vm356_vm13, %v347_v58 }

</bundles_post_ra>
